<compile_context>
chip_gen: v5e
topology: v5e:2x2
jax: 0.10.0
libtpu: 0.0.40
codegen_flags: <defaults>
</compile_context>

<pallas_src>
import functools

import jax
import jax.numpy as jnp
from jax.experimental import pallas as pl
from jax.experimental.pallas import tpu as pltpu

GAMMA = 2.0          # compile-time constant -> explicit square in the kernel
CLASS_NUM = 8

# Deterministic alpha weights from the module's __init__
ALPHA = jnp.array(
    [1.0, 3061 / 669, 3061 / 105, 3061 / 2868,
     3061 / 219, 3061 / 61, 3061 / 653, 3061 / 230],
    dtype=jnp.float32,
)


def _focal_loss_kernel(logits_ref, targets_ref, alpha_ref, out_ref, *,
                       n_total, tile_n):
    """One batch tile.

    logits_ref : (C, TILE_N) logits (classes on sublanes, batch on lanes)
    targets_ref: (1, TILE_N) int32 class ids
    alpha_ref  : (C, 1) float32 class weights
    out_ref    : (1, TILE_N) float32 per-row loss (padded cols set to 0)
    """
    i = pl.program_id(0)

    x = logits_ref[...].astype(jnp.float32)      # upcast after load (bf16 ok)
    t = targets_ref[...]                         # (1, T) int32
    a = alpha_ref[...]                           # (C, 1) f32

    # One-hot class mask: sublane-index iota == target row (scatter_ equivalent).
    # TODO(synk): targets are assumed in-range [0, C); out-of-range ids yield 0 loss.
    cls = jax.lax.broadcasted_iota(jnp.int32, x.shape, 0)   # (C, T)
    onehot = (cls == t).astype(jnp.float32)                 # (C, T)

    # Log-sum-exp over the (8-deep) class/sublane axis.
    m = jnp.max(x, axis=0, keepdims=True)                             # (1, T)
    lse = jnp.log(jnp.sum(jnp.exp(x - m), axis=0, keepdims=True))     # (1, T)

    # True-class logit and per-row alpha via masked sublane reduces.
    x_true = jnp.sum(x * onehot, axis=0, keepdims=True)               # (1, T)
    alpha_row = jnp.sum(a * onehot, axis=0, keepdims=True)            # (1, T)

    logp = (x_true - m) - lse                    # log softmax of the true class
    p = jnp.exp(logp)                            # softmax prob of the true class
    one_minus = 1.0 - p
    loss = -alpha_row * one_minus * one_minus * logp                  # (1, T)

    # Zero out padded batch columns so the wrapper-side sum is exact.
    col = i * tile_n + jax.lax.broadcasted_iota(jnp.int32, loss.shape, 1)
    out_ref[...] = jnp.where(col < n_total, loss, 0.0)


def focal_loss(logits, targets, *, alpha=ALPHA, tile_n=4096):
    """logits: (N, C) float/bf16; targets: (N,) int class ids. Returns scalar."""
    N, C = logits.shape

    # Lane-dense tile size: multiple of 128, capped so tiny batches pad little.
    tile_n = min(tile_n, 128 * pl.cdiv(N, 128))
    num_tiles = pl.cdiv(N, tile_n)
    n_pad = tile_n * num_tiles

    # Wrapper-side layout plumbing: (N, C) -> (C, N_pad); classes on sublanes,
    # batch on lanes. Keep the input dtype (upcast happens inside the kernel).
    logits_t = jnp.pad(jnp.transpose(logits), ((0, 0), (0, n_pad - N)))
    targets_row = jnp.pad(targets.astype(jnp.int32).reshape(1, N),
                          ((0, 0), (0, n_pad - N)))
    alpha_col = alpha.astype(jnp.float32).reshape(C, 1)

    kernel = functools.partial(_focal_loss_kernel, n_total=N, tile_n=tile_n)

    per_row_loss = pl.pallas_call(
        kernel,
        out_shape=jax.ShapeDtypeStruct((1, n_pad), jnp.float32),
        grid=(num_tiles,),
        in_specs=[
            pl.BlockSpec((C, tile_n), lambda i: (0, i)),   # logits tile
            pl.BlockSpec((1, tile_n), lambda i: (0, i)),   # targets tile
            pl.BlockSpec((C, 1), lambda i: (0, 0)),        # alpha (resident)
        ],
        out_specs=pl.BlockSpec((1, tile_n), lambda i: (0, i)),
        compiler_params=pltpu.CompilerParams(
            dimension_semantics=("parallel",)),
        cost_estimate=pl.CostEstimate(
            flops=N * (4 * C + 10),
            transcendentals=N * (C + 1),
            bytes_accessed=N * (logits.dtype.itemsize * C + 8),
        ),
    )(logits_t, targets_row, alpha_col)

    # size_average=True -> mean over the true batch size.
    return jnp.sum(per_row_loss) / N


def focal_loss_ref(logits, targets):
    """Pure-JAX reference matching the PyTorch forward."""
    p = jax.nn.softmax(logits.astype(jnp.float32), axis=1)
    mask = jax.nn.one_hot(targets, logits.shape[1], dtype=jnp.float32)
    probs = jnp.sum(p * mask, axis=1)
    alpha = ALPHA[targets]
    batch_loss = -alpha * jnp.power(1.0 - probs, GAMMA) * jnp.log(probs)
    return jnp.mean(batch_loss)


if __name__ == "__main__":
    key = jax.random.PRNGKey(0)
    k1, k2 = jax.random.split(key)
    N, C = 8, CLASS_NUM
    logits = jax.random.normal(k1, (N, C), dtype=jnp.float32)
    targets = jax.random.randint(k2, (N,), 0, C, dtype=jnp.int32)

    loss = focal_loss(logits, targets)
    jax.block_until_ready(loss)

    ref = focal_loss_ref(logits, targets)
    assert jnp.allclose(loss, ref, rtol=1e-5, atol=1e-5), (loss, ref)
    print("KERNEL_OK")
</pallas_src>

<mosaic_0001>
module attributes {stable_mosaic.version = 11 : i64} {
  func.func @_focal_loss_kernel(%arg0: i32, %arg1: memref<8x128xf32, #tpu.memory_space<vmem>>, %arg2: memref<1x128xi32, #tpu.memory_space<vmem>>, %arg3: memref<8x1xf32, #tpu.memory_space<vmem>>, %arg4: memref<1x128xf32, #tpu.memory_space<vmem>>) attributes {dimension_semantics = [#tpu.dimension_semantics<parallel>], iteration_bounds = array<i64: 1>, scalar_prefetch = 0 : i64, scratch_operands = 0 : i64, tpu.core_type = #tpu.core_type<tc>, window_params = [{transform_indices = @transform_0, window_bounds = array<i64: 8, 128>}, {transform_indices = @transform_1, window_bounds = array<i64: 1, 128>}, {pipeline_mode = #tpu.pipeline_mode<synchronous>, transform_indices = @transform_2, window_bounds = array<i64: 8, 1>}, {transform_indices = @transform_3, window_bounds = array<i64: 1, 128>}]} {
    %c0 = arith.constant 0 : index
    %c0_0 = arith.constant 0 : index
    %0 = vector.load %arg1[%c0, %c0_0] : memref<8x128xf32, #tpu.memory_space<vmem>>, vector<8x128xf32>
    %c0_1 = arith.constant 0 : index
    %c0_2 = arith.constant 0 : index
    %1 = vector.load %arg2[%c0_1, %c0_2] : memref<1x128xi32, #tpu.memory_space<vmem>>, vector<1x128xi32>
    %c0_3 = arith.constant 0 : index
    %c0_4 = arith.constant 0 : index
    %2 = vector.load %arg3[%c0_3, %c0_4] : memref<8x1xf32, #tpu.memory_space<vmem>>, vector<8x1xf32>
    %3 = tpu.iota {dimensions = array<i32: 0>} : vector<8x128xi32>
    %4 = vector.broadcast %1 : vector<1x128xi32> to vector<8x128xi32>
    %5 = arith.cmpi eq, %3, %4 : vector<8x128xi32>
    %6 = arith.extui %5 : vector<8x128xi1> to vector<8x128xi32>
    %7 = arith.sitofp %6 : vector<8x128xi32> to vector<8x128xf32>
    %cst = arith.constant dense<0xFF800000> : vector<128xf32>
    %8 = vector.multi_reduction <maximumf>, %0, %cst [0] : vector<8x128xf32> to vector<128xf32>
    %9 = vector.shape_cast %8 : vector<128xf32> to vector<1x128xf32>
    %10 = vector.broadcast %9 : vector<1x128xf32> to vector<8x128xf32>
    %11 = arith.subf %0, %10 : vector<8x128xf32>
    %12 = math.exp %11 : vector<8x128xf32>
    %cst_5 = arith.constant dense<0.000000e+00> : vector<128xf32>
    %13 = vector.multi_reduction <add>, %12, %cst_5 [0] : vector<8x128xf32> to vector<128xf32>
    %14 = vector.shape_cast %13 : vector<128xf32> to vector<1x128xf32>
    %15 = math.log %14 : vector<1x128xf32>
    %16 = arith.mulf %0, %7 : vector<8x128xf32>
    %cst_6 = arith.constant dense<0.000000e+00> : vector<128xf32>
    %17 = vector.multi_reduction <add>, %16, %cst_6 [0] : vector<8x128xf32> to vector<128xf32>
    %18 = vector.shape_cast %17 : vector<128xf32> to vector<1x128xf32>
    %19 = vector.broadcast %2 : vector<8x1xf32> to vector<8x128xf32>
    %20 = arith.mulf %19, %7 : vector<8x128xf32>
    %cst_7 = arith.constant dense<0.000000e+00> : vector<128xf32>
    %21 = vector.multi_reduction <add>, %20, %cst_7 [0] : vector<8x128xf32> to vector<128xf32>
    %22 = vector.shape_cast %21 : vector<128xf32> to vector<1x128xf32>
    %23 = arith.subf %18, %9 : vector<1x128xf32>
    %24 = arith.subf %23, %15 : vector<1x128xf32>
    %25 = math.exp %24 : vector<1x128xf32>
    %cst_8 = arith.constant 1.000000e+00 : f32
    %26 = vector.broadcast %cst_8 : f32 to vector<1x128xf32>
    %27 = arith.subf %26, %25 : vector<1x128xf32>
    %cst_9 = arith.constant 0.000000e+00 : f32
    %28 = vector.broadcast %cst_9 : f32 to vector<1x128xf32>
    %29 = arith.subf %28, %22 : vector<1x128xf32>
    %30 = arith.mulf %29, %27 : vector<1x128xf32>
    %31 = arith.mulf %30, %27 : vector<1x128xf32>
    %32 = arith.mulf %31, %24 : vector<1x128xf32>
    %c128_i32 = arith.constant 128 : i32
    %33 = arith.muli %arg0, %c128_i32 : i32
    %34 = tpu.iota {dimensions = array<i32: 1>} : vector<1x128xi32>
    %35 = vector.broadcast %33 : i32 to vector<1x128xi32>
    %36 = arith.addi %35, %34 : vector<1x128xi32>
    %c8_i32 = arith.constant 8 : i32
    %37 = vector.broadcast %c8_i32 : i32 to vector<1x128xi32>
    %38 = arith.cmpi slt, %36, %37 : vector<1x128xi32>
    %cst_10 = arith.constant 0.000000e+00 : f32
    %39 = vector.broadcast %cst_10 : f32 to vector<1x128xf32>
    %40 = arith.select %38, %32, %39 : vector<1x128xi1>, vector<1x128xf32>
    %c0_11 = arith.constant 0 : index
    %c0_12 = arith.constant 0 : index
    %41 = vector.load %arg4[%c0_11, %c0_12] : memref<1x128xf32, #tpu.memory_space<vmem>>, vector<1x128xf32>
    tpu.vector_store %arg4[%c0_11, %c0_12], %40 {strides = array<i32>} : memref<1x128xf32, #tpu.memory_space<vmem>>, vector<1x128xf32>,
    return
  }
  func.func @transform_0(%arg0: i32) -> (i32, i32) {
    %c0_i32 = arith.constant 0 : i32
    %c0_i32_0 = arith.constant 0 : i32
    return %c0_i32, %arg0 : i32, i32
  }
  func.func @transform_1(%arg0: i32) -> (i32, i32) {
    %c0_i32 = arith.constant 0 : i32
    %c0_i32_0 = arith.constant 0 : i32
    return %c0_i32, %arg0 : i32, i32
  }
  func.func @transform_2(%arg0: i32) -> (i32, i32) {
    %c0_i32 = arith.constant 0 : i32
    %c0_i32_0 = arith.constant 0 : i32
    %c0_i32_1 = arith.constant 0 : i32
    return %c0_i32, %c0_i32_0 : i32, i32
  }
  func.func @transform_3(%arg0: i32) -> (i32, i32) {
    %c0_i32 = arith.constant 0 : i32
    %c0_i32_0 = arith.constant 0 : i32
    return %c0_i32, %arg0 : i32, i32
  }
}

</mosaic_0001>

<bundles_post_ra>
// kernel: tpu_custom_call.1
= control target key start
LH: loop header
LB: loop body
LE: loop exit
PB: predicated region body
PF: predicated region fallthrough
CT: control target
= control target key end

     0   :  { %v131_v1 = vmov 0   ;;  %s166_s0 = inlined_call_operand.vmem [shape: f32[8,128], index: 0, kind: input, shape index: {}]   ;;  %s167_s1 = inlined_call_operand.vmem [shape: s32[1,128], index: 1, kind: input, shape index: {}]   ;;  %s168_s2 = inlined_call_operand.vmem [shape: f32[8,1], index: 2, kind: input, shape index: {}]   ;;  %s169_s3 = inlined_call_operand.hbm [shape: f32[1,128], index: 3, kind: output, shape index: {}]  }
   0x1   :  { %v17_v0 = vld [vmem:[%s168_s2] sm:$0xff]  ;;  %97 = vset.pattern.permute.xlu0 %v131_v1 }
   0x2   :  { %8 = vsyncpa [#allocation3], 0  ;;  %50 = vperm.xlu0 %97, %v17_v0   ;;  %v15_v2 = vld [vmem:[%s166_s0] sm:$0xff]  ;;  %v18_v11 = vlaneseq  ;;  %v132_v16 = vmov 0.0   ;;  %s133_s0 = smov [#allocation2]   ;;  %s84_s19 = sshll.u32 %s169_s3, 4  ;;  %s85_s19 = int_to_ptr.hbm [resolvable:$true] %s84_s19 }
   0x3   :  { %v24_v3 = vrot.slane %v15_v2, 4  ;;  %v98_v13 = vld [vmem:[%s167_s1] ss:$0 sm:$0xff]  ;;  %s82_s1 = sshll.u32 %s133_s0, 4  ;;  %s83_s1 = int_to_ptr.vmem [resolvable:$true] %s82_s1 }
   0x4   :  { %v19_v12 = vshrl.u32 %v18_v11, 7  ;;  %v71_v46 = vand.u32 127, %v18_v11 }
   0x5   :  { %v25_v4 = vmax.f32 %v15_v2, %v24_v3 }
   0x6   :  { %vm21_vm0 = vcmp.eq.s32.totalorder %v19_v12, %v98_v13  ;;  %vm74_vm1 = vcmp.lt.s32.totalorder %v71_v46, 8 }
   0x7   :  { %v26_v5 = vrot.slane %v25_v4, 2  ;;  %v93_v17 = vsel %vm21_vm0, 1.0, %v132_v16 }
   0x8   :  { %v41_v19 = vmul.f32 %v93_v17, %v15_v2 }
   0x9   :  { %v27_v6 = vmax.f32 %v25_v4, %v26_v5 }
   0xa   :  { %v42_v21 = vrot.slane %v41_v19, 4 }
   0xb   :  { %v28_v7 = vrot.slane %v27_v6, 1 }
   0xc   :  { %v43_v23 = vadd.f32 %v42_v21, %v41_v19 }
   0xd   :  { %v29_v8 = vmax.f32 %v27_v6, %v28_v7 }
   0xe   :  { %v44_v25 = vrot.slane %v43_v23, 2 }
   0xf   :  { %v30_v9 = vsub.f32 %v15_v2, %v29_v8 }
  0x10   :  { %v45_v27 = vadd.f32 %v44_v25, %v43_v23 }
  0x11   :  { %v31_v10 = vmul.f32 1.442695, %v30_v9 }
  0x12   :  { %v46_v28 = vrot.slane %v45_v27, 1 }
  0x13   :  { %99 = vpow2.f32 %v31_v10 }
  0x14   :  { %v47_v29 = vadd.f32 %v46_v28, %v45_v27 }
  0x16   :  { %v60_v32 = vsub.f32 %v47_v29, %v29_v8 }
  0x19   :  { %v100_v14 = vpop.eup %99 }
  0x1a   :  { %v33_v15 = vrot.slane %v100_v14, 4 }
  0x1c   :  { %v34_v18 = vadd.f32 %v100_v14, %v33_v15 }
  0x1e   :  { %v35_v20 = vrot.slane %v34_v18, 2 }
  0x20   :  { %v36_v22 = vadd.f32 %v35_v20, %v34_v18 }
  0x22   :  { %v37_v24 = vrot.slane %v36_v22, 1 }
  0x24   :  { %v38_v26 = vadd.f32 %v37_v24, %v36_v22 }
  0x26   :  { %101 = vlog2.f32 %v38_v26 }
  0x2c   :  { %v102_v30 = vpop.eup %101 }
  0x2d   :  { %v40_v31 = vmul.f32 0.6931472, %v102_v30 }
  0x2f   :  { %v61_v33 = vsub.f32 %v60_v32, %v40_v31 }
  0x31   :  { %v62_v35 = vmul.f32 1.442695, %v61_v33 }
  0x33   :  { %103 = vpow2.f32 %v62_v35 }
  0x39   :  { %v104_v41 = vpop.eup %103 }
  0x3a   :  { %v64_v44 = vsub.f32 1.0, %v104_v41 }
  0x74   :  { %v51_v34 = vpop.permute.xlu0 %50 }
  0x75   :  { %v53_v36 = vmul.f32 %v93_v17, %v51_v34 }
  0x77   :  { %v54_v37 = vrot.slane %v53_v36, 4 }
  0x79   :  { %v55_v38 = vadd.f32 %v54_v37, %v53_v36 }
  0x7b   :  { %v56_v39 = vrot.slane %v55_v38, 2 }
  0x7d   :  { %v57_v40 = vadd.f32 %v56_v39, %v55_v38 }
  0x7f   :  { %v58_v42 = vrot.slane %v57_v40, 1 }
  0x81   :  { %v59_v43 = vadd.f32 %v58_v42, %v57_v40 }
  0x83   :  { %v65_v45 = vsub.f32 0.0, %v59_v43 }
  0x85   :  { %v66_v47 = vmul.f32 %v65_v45, %v64_v44 }
  0x87   :  { %v67_v48 = vmul.f32 %v66_v47, %v64_v44 }
  0x89   :  { %v68_v49 = vmul.f32 %v67_v48, %v61_v33 }
  0x8b   :  { %v75_v50 = vsel %vm74_vm1, %v68_v49, 0.0 }
  0x8c   :  { %76 = vst [vmem:[#allocation2] sm:$0x1] %v75_v50 }
  0x8d   :  { %87 = dma.vmem_to_hbm [thread:$0]  %s83_s1, 16, %s85_s19, [#allocation3]  }
  0x8e   :  { %129 = dma.done.wait [#allocation3], 16  }
  0x8f   :  { %130 = vsyncadd [#allocation3], 4294967280 }
  0x90   :  { %92 = vsyncpa [#allocation3], 1 }

</bundles_post_ra>
